<compile_context>
chip_gen: v5e
topology: v5e:2x2
jax: 0.10.0
libtpu: 0.0.40
codegen_flags: <defaults>
</compile_context>

<pallas_src>
import functools

import jax
import jax.numpy as jnp
from jax.experimental import pallas as pl
from jax.experimental.pallas import tpu as pltpu

HIDDEN = 128


def actor_kernel(state_t_ref, eps_ref, w1t_ref, b1_ref, wht_ref, bh_ref, out_ref):
    """One batch tile, batch on lanes.

    state_t_ref : (in_dim, TB)        eps_ref : (out_dim, TB)
    w1t_ref     : (128, in_dim)       b1_ref  : (128, 1)
    wht_ref     : (2*out_dim, 128)    bh_ref  : (2*out_dim, 1)
    out_ref     : (3*out_dim, TB)  packed [action ; mu ; std] along sublanes.
    """
    out_dim = eps_ref.shape[0]

    # Hidden layer + ReLU: (128, in_dim) @ (in_dim, TB) -> (128, TB).
    h = jnp.dot(w1t_ref[...], state_t_ref[...],
                preferred_element_type=jnp.float32)
    h = jnp.maximum(h + b1_ref[...], 0.0)

    # Fused mu/log_std heads: (2*out_dim, 128) @ (128, TB) -> (2*out_dim, TB).
    z = jnp.dot(wht_ref[...], h, preferred_element_type=jnp.float32) + bh_ref[...]

    mu = jnp.tanh(z[:out_dim, :]) * 2.0
    # exp(softplus(x)) == 1 + exp(x): one transcendental instead of three.
    std = 1.0 + jnp.exp(z[out_dim:, :])

    # Reparameterized Normal sample (eps supplied lane-dense).
    action = mu + std * eps_ref[...]

    # Three sublane slice stores into the lane-dense output slab.
    out_ref[pl.ds(0, out_dim), :] = action
    out_ref[pl.ds(out_dim, out_dim), :] = mu
    out_ref[pl.ds(2 * out_dim, out_dim), :] = std


def _batch_tile(B, block_b):
    """Pick the batch (lane) tile.

    Tile size is driven by VMEM budget and the ~0.35us per-grid-step overhead,
    not by vreg capacity.  For small B a single full-batch block is legal
    (lane dim == full array dim); otherwise tiles are multiples of 128 lanes,
    and we force >= 2 grid steps so v7x's two TensorCores both get work.
    """
    if B <= 256:
        return B
    half = -(-B // 2)                  # cdiv(B, 2)
    half = -(-half // 128) * 128       # round up to a multiple of 128 lanes
    return min(block_b, half)


@functools.partial(jax.jit, static_argnames=("block_b",))
def actor_forward(state, w1t, b1, wht, bh, eps, block_b=8192):
    """Actor forward pass. Returns (action, mu, std), each (B, out_dim)."""
    B, in_dim = state.shape
    hidden = w1t.shape[0]
    out_dim = wht.shape[0] // 2

    # Batch-on-lanes layout (layout plumbing only; lane-dense inside kernel).
    state_t = state.T                                  # (in_dim, B)

    tb = _batch_tile(B, block_b)
    nb = pl.cdiv(B, tb)

    grid_spec = pltpu.PrefetchScalarGridSpec(
        num_scalar_prefetch=0,
        grid=(nb,),
        in_specs=[
            pl.BlockSpec((in_dim, tb), lambda i: (0, i)),            # state_T
            pl.BlockSpec((out_dim, tb), lambda i: (0, i)),           # eps
            pl.BlockSpec((hidden, in_dim), lambda i: (0, 0)),        # W1 (torch layout)
            pl.BlockSpec((hidden, 1), lambda i: (0, 0)),             # b1
            pl.BlockSpec((2 * out_dim, hidden), lambda i: (0, 0)),   # fused head weights
            pl.BlockSpec((2 * out_dim, 1), lambda i: (0, 0)),        # fused head biases
        ],
        out_specs=pl.BlockSpec((3 * out_dim, tb), lambda i: (0, i)),
    )

    packed_t = pl.pallas_call(
        actor_kernel,
        out_shape=jax.ShapeDtypeStruct((3 * out_dim, B), jnp.float32),
        grid_spec=grid_spec,
        compiler_params=pltpu.CompilerParams(
            dimension_semantics=("parallel",),
            vmem_limit_bytes=64 * 1024 * 1024),
    )(state_t, eps, w1t, b1, wht, bh)

    action = packed_t[:out_dim, :].T
    mu = packed_t[out_dim:2 * out_dim, :].T
    std = packed_t[2 * out_dim:, :].T
    return action, mu, std


def init_params(key, in_dim, out_dim, hidden=HIDDEN, init_w=0.003):
    """Synthetic init mirroring the PyTorch module, in torch (out,in) layout.

    hidden1: default nn.Linear init (uniform +/- 1/sqrt(fan_in));
    mu / log_std heads: uniform +/- init_w (initialize_uniformly).
    The two head layers are fused into one (2*out_dim, hidden) buffer.
    """
    k1, k2, k3, k4, k5, k6 = jax.random.split(key, 6)
    bound1 = 1.0 / jnp.sqrt(jnp.float32(in_dim))
    w1t = jax.random.uniform(k1, (hidden, in_dim), jnp.float32, -bound1, bound1)
    b1 = jax.random.uniform(k2, (hidden, 1), jnp.float32, -bound1, bound1)
    wmu = jax.random.uniform(k3, (out_dim, hidden), jnp.float32, -init_w, init_w)
    bmu = jax.random.uniform(k4, (out_dim, 1), jnp.float32, -init_w, init_w)
    wls = jax.random.uniform(k5, (out_dim, hidden), jnp.float32, -init_w, init_w)
    bls = jax.random.uniform(k6, (out_dim, 1), jnp.float32, -init_w, init_w)
    return {
        "w1t": w1t,
        "b1": b1,
        "wht": jnp.concatenate([wmu, wls], axis=0),   # (2*out_dim, hidden)
        "bh": jnp.concatenate([bmu, bls], axis=0),    # (2*out_dim, 1)
    }


if __name__ == "__main__":
    key = jax.random.PRNGKey(0)
    k_params, k_state, k_eps = jax.random.split(key, 3)

    B, IN_DIM, OUT_DIM = 8, 16, 4

    params = init_params(k_params, IN_DIM, OUT_DIM)
    state = jax.random.normal(k_state, (B, IN_DIM), jnp.float32)
    # eps ~ N(0,1), batch-on-lanes layout (out_dim, B).
    eps = jax.random.normal(k_eps, (OUT_DIM, B), jnp.float32)

    action, mu, std = actor_forward(
        state, params["w1t"], params["b1"], params["wht"], params["bh"], eps)
    jax.block_until_ready((action, mu, std))

    # Plain-JAX reference.
    h_ref = jnp.maximum(state @ params["w1t"].T + params["b1"].T, 0.0)
    z_ref = h_ref @ params["wht"].T + params["bh"].T            # (B, 2*out_dim)
    mu_ref = jnp.tanh(z_ref[:, :OUT_DIM]) * 2.0
    std_ref = jnp.exp(jax.nn.softplus(z_ref[:, OUT_DIM:]))
    action_ref = mu_ref + std_ref * eps.T

    assert jnp.allclose(mu, mu_ref, atol=1e-4, rtol=1e-4), "mu mismatch"
    assert jnp.allclose(std, std_ref, atol=1e-4, rtol=1e-4), "std mismatch"
    assert jnp.allclose(action, action_ref, atol=1e-4, rtol=1e-4), "action mismatch"

    print("KERNEL_OK")
</pallas_src>

<mosaic_0001>
module attributes {stable_mosaic.version = 11 : i64} {
  func.func @actor_kernel(%arg0: i32, %arg1: memref<16x8xf32, #tpu.memory_space<vmem>>, %arg2: memref<4x8xf32, #tpu.memory_space<vmem>>, %arg3: memref<128x16xf32, #tpu.memory_space<vmem>>, %arg4: memref<128x1xf32, #tpu.memory_space<vmem>>, %arg5: memref<8x128xf32, #tpu.memory_space<vmem>>, %arg6: memref<8x1xf32, #tpu.memory_space<vmem>>, %arg7: memref<12x8xf32, #tpu.memory_space<vmem>>) attributes {dimension_semantics = [#tpu.dimension_semantics<parallel>], iteration_bounds = array<i64: 1>, scalar_prefetch = 0 : i64, scratch_operands = 0 : i64, tpu.core_type = #tpu.core_type<tc>, window_params = [{transform_indices = @transform_0, window_bounds = array<i64: 16, 8>}, {transform_indices = @transform_1, window_bounds = array<i64: 4, 8>}, {pipeline_mode = #tpu.pipeline_mode<synchronous>, transform_indices = @transform_2, window_bounds = array<i64: 128, 16>}, {pipeline_mode = #tpu.pipeline_mode<synchronous>, transform_indices = @transform_3, window_bounds = array<i64: 128, 1>}, {pipeline_mode = #tpu.pipeline_mode<synchronous>, transform_indices = @transform_4, window_bounds = array<i64: 8, 128>}, {pipeline_mode = #tpu.pipeline_mode<synchronous>, transform_indices = @transform_5, window_bounds = array<i64: 8, 1>}, {transform_indices = @transform_6, window_bounds = array<i64: 12, 8>}]} {
    %c0 = arith.constant 0 : index
    %c0_0 = arith.constant 0 : index
    %0 = vector.load %arg3[%c0, %c0_0] : memref<128x16xf32, #tpu.memory_space<vmem>>, vector<128x16xf32>
    %c0_1 = arith.constant 0 : index
    %c0_2 = arith.constant 0 : index
    %1 = vector.load %arg1[%c0_1, %c0_2] : memref<16x8xf32, #tpu.memory_space<vmem>>, vector<16x8xf32>
    %cst = arith.constant dense<0.000000e+00> : vector<128x8xf32>
    %2 = tpu.matmul %0, %1, %cst {dimension_numbers = #tpu.dot_dimension_numbers<[1], [0], [0], [1], [0, 0, 1, 1], [], []>} : vector<128x16xf32>, vector<16x8xf32>, vector<128x8xf32> -> vector<128x8xf32>
    %c0_3 = arith.constant 0 : index
    %c0_4 = arith.constant 0 : index
    %3 = vector.load %arg4[%c0_3, %c0_4] : memref<128x1xf32, #tpu.memory_space<vmem>>, vector<128x1xf32>
    %4 = vector.broadcast %3 : vector<128x1xf32> to vector<128x8xf32>
    %5 = arith.addf %2, %4 : vector<128x8xf32>
    %cst_5 = arith.constant 0.000000e+00 : f32
    %6 = vector.broadcast %cst_5 : f32 to vector<128x8xf32>
    %7 = arith.maximumf %5, %6 : vector<128x8xf32>
    %c0_6 = arith.constant 0 : index
    %c0_7 = arith.constant 0 : index
    %8 = vector.load %arg5[%c0_6, %c0_7] : memref<8x128xf32, #tpu.memory_space<vmem>>, vector<8x128xf32>
    %cst_8 = arith.constant dense<0.000000e+00> : vector<8x8xf32>
    %9 = tpu.matmul %8, %7, %cst_8 {dimension_numbers = #tpu.dot_dimension_numbers<[1], [0], [0], [1], [0, 0, 1, 1], [], []>} : vector<8x128xf32>, vector<128x8xf32>, vector<8x8xf32> -> vector<8x8xf32>
    %c0_9 = arith.constant 0 : index
    %c0_10 = arith.constant 0 : index
    %10 = vector.load %arg6[%c0_9, %c0_10] : memref<8x1xf32, #tpu.memory_space<vmem>>, vector<8x1xf32>
    %11 = vector.broadcast %10 : vector<8x1xf32> to vector<8x8xf32>
    %12 = arith.addf %9, %11 : vector<8x8xf32>
    %13 = vector.extract_strided_slice %12 {offsets = [0, 0], sizes = [4, 8], strides = [1, 1]} : vector<8x8xf32> to vector<4x8xf32>
    %14 = math.tanh %13 : vector<4x8xf32>
    %cst_11 = arith.constant 2.000000e+00 : f32
    %15 = vector.broadcast %cst_11 : f32 to vector<4x8xf32>
    %16 = arith.mulf %14, %15 : vector<4x8xf32>
    %17 = vector.extract_strided_slice %12 {offsets = [4, 0], sizes = [4, 8], strides = [1, 1]} : vector<8x8xf32> to vector<4x8xf32>
    %18 = math.exp %17 : vector<4x8xf32>
    %cst_12 = arith.constant 1.000000e+00 : f32
    %19 = vector.broadcast %cst_12 : f32 to vector<4x8xf32>
    %20 = arith.addf %19, %18 : vector<4x8xf32>
    %c0_13 = arith.constant 0 : index
    %c0_14 = arith.constant 0 : index
    %21 = vector.load %arg2[%c0_13, %c0_14] : memref<4x8xf32, #tpu.memory_space<vmem>>, vector<4x8xf32>
    %22 = arith.mulf %20, %21 : vector<4x8xf32>
    %23 = arith.addf %16, %22 : vector<4x8xf32>
    %c0_15 = arith.constant 0 : index
    %c0_16 = arith.constant 0 : index
    %24 = vector.load %arg7[%c0_15, %c0_16] : memref<12x8xf32, #tpu.memory_space<vmem>>, vector<4x8xf32>
    tpu.vector_store %arg7[%c0_15, %c0_16], %23 {strides = array<i32>} : memref<12x8xf32, #tpu.memory_space<vmem>>, vector<4x8xf32>,
    %c4 = arith.constant 4 : index
    %c0_17 = arith.constant 0 : index
    %25 = vector.load %arg7[%c4, %c0_17] : memref<12x8xf32, #tpu.memory_space<vmem>>, vector<4x8xf32>
    tpu.vector_store %arg7[%c4, %c0_17], %16 {strides = array<i32>} : memref<12x8xf32, #tpu.memory_space<vmem>>, vector<4x8xf32>,
    %c8 = arith.constant 8 : index
    %c0_18 = arith.constant 0 : index
    %26 = vector.load %arg7[%c8, %c0_18] : memref<12x8xf32, #tpu.memory_space<vmem>>, vector<4x8xf32>
    tpu.vector_store %arg7[%c8, %c0_18], %20 {strides = array<i32>} : memref<12x8xf32, #tpu.memory_space<vmem>>, vector<4x8xf32>,
    return
  }
  func.func @transform_0(%arg0: i32) -> (i32, i32) {
    %c0_i32 = arith.constant 0 : i32
    %c0_i32_0 = arith.constant 0 : i32
    return %c0_i32, %arg0 : i32, i32
  }
  func.func @transform_1(%arg0: i32) -> (i32, i32) {
    %c0_i32 = arith.constant 0 : i32
    %c0_i32_0 = arith.constant 0 : i32
    return %c0_i32, %arg0 : i32, i32
  }
  func.func @transform_2(%arg0: i32) -> (i32, i32) {
    %c0_i32 = arith.constant 0 : i32
    %c0_i32_0 = arith.constant 0 : i32
    %c0_i32_1 = arith.constant 0 : i32
    return %c0_i32, %c0_i32_0 : i32, i32
  }
  func.func @transform_3(%arg0: i32) -> (i32, i32) {
    %c0_i32 = arith.constant 0 : i32
    %c0_i32_0 = arith.constant 0 : i32
    %c0_i32_1 = arith.constant 0 : i32
    return %c0_i32, %c0_i32_0 : i32, i32
  }
  func.func @transform_4(%arg0: i32) -> (i32, i32) {
    %c0_i32 = arith.constant 0 : i32
    %c0_i32_0 = arith.constant 0 : i32
    %c0_i32_1 = arith.constant 0 : i32
    return %c0_i32, %c0_i32_0 : i32, i32
  }
  func.func @transform_5(%arg0: i32) -> (i32, i32) {
    %c0_i32 = arith.constant 0 : i32
    %c0_i32_0 = arith.constant 0 : i32
    %c0_i32_1 = arith.constant 0 : i32
    return %c0_i32, %c0_i32_0 : i32, i32
  }
  func.func @transform_6(%arg0: i32) -> (i32, i32) {
    %c0_i32 = arith.constant 0 : i32
    %c0_i32_0 = arith.constant 0 : i32
    return %c0_i32, %arg0 : i32, i32
  }
}

</mosaic_0001>

<bundles_post_ra>
// kernel: actor_forward.1
= control target key start
LH: loop header
LB: loop body
LE: loop exit
PB: predicated region body
PF: predicated region fallthrough
CT: control target
= control target key end

     0   :  { %v345_v0 = vmov 0   ;;  %vm137_vm0 = vcmask 130048   ;;  %vm308_vm1 = vcmask 60416   ;;  %vm311_vm2 = vcmask 64516   ;;  %s520_s3 = inlined_call_operand.vmem [shape: f32[128,1], index: 3, kind: input, shape index: {}]   ;;  %s521_s0 = inlined_call_operand.vmem [shape: f32[16,8], index: 0, kind: input, shape index: {}]   ;;  %s522_s2 = inlined_call_operand.vmem [shape: f32[128,16], index: 2, kind: input, shape index: {}]   ;;  %s523_s5 = inlined_call_operand.vmem [shape: f32[8,1], index: 5, kind: input, shape index: {}]   ;;  %s524_s4 = inlined_call_operand.vmem [shape: f32[8,128], index: 4, kind: input, shape index: {}]   ;;  %s525_s1 = inlined_call_operand.vmem [shape: f32[4,8], index: 1, kind: input, shape index: {}]   ;;  %s526_s6 = inlined_call_operand.vmem [shape: f32[12,8], index: 6, kind: output, shape index: {}]  }
   0x1   :  { %339 = vset.pattern.permute.xlu1 %v345_v0  ;;  %v54_v1 = vld [vmem:[%s520_s3 + $0x68] sm:$0xff]  ;;  %338 = vset.pattern.permute.xlu0 %v345_v0  ;;  %v56_v3 = vld [vmem:[%s520_s3 + $0x78] sm:$0xff]  ;;  %v39_v4 = vld [vmem:[%s521_s0] sm:$0xff] }
   0x2   :  { %v40_v2 = vld [vmem:[%s521_s0 + $0x8] sm:$0xff]  ;;  %124 = vperm.xlu1 %339, %v54_v1   ;;  %134 = vperm.xlu0 %338, %v56_v3   ;;  %v34_v6 = vld [vmem:[%s522_s2 + $0x58] sm:$0xff]  ;;  %v23_v7 = vld [vmem:[%s522_s2] sm:$0xff] }
   0x3   :  { %333 = vmatpush.msra.mxu2 %v40_v2  ;;  %v28_v5 = vld [vmem:[%s522_s2 + $0x28] sm:$0xff]  ;;  %334 = vmatpush.msra.mxu3 %v40_v2  ;;  %v53_v8 = vld [vmem:[%s520_s3 + $0x60] sm:$0xff]  ;;  %v55_v9 = vld [vmem:[%s520_s3 + $0x70] sm:$0xff] }
   0x4   :  { %200 = vmatpush.msra.mxu0 %v40_v2  ;;  %340 = vset.pattern.permute.xlu2 %v345_v0  ;;  %v29_v10 = vld [vmem:[%s522_s2 + $0x30] sm:$0xff]  ;;  %v52_v11 = vld [vmem:[%s520_s3 + $0x58] sm:$0xff]  ;;  %v35_v12 = vld [vmem:[%s522_s2 + $0x60] sm:$0xff] }
   0x5   :  { %335 = vmatpush.msra.mxu2 %v39_v4  ;;  %336 = vmatpush.msra.mxu3 %v39_v4  ;;  %v24_v13 = vld [vmem:[%s522_s2 + $0x8] sm:$0xff]  ;;  %v49_v14 = vld [vmem:[%s520_s3 + $0x40] sm:$0xff]  ;;  %v51_v16 = vld [vmem:[%s520_s3 + $0x50] sm:$0xff] }
   0x6   :  { %322 = vmatmul.msk.f32.vlgmr.msra.gmra.mxu2 %vm137_vm0, %v28_v5  ;;  %328 = vmatmul.msk.f32.vlgmr.msra.gmra.mxu3 %vm137_vm0, %v34_v6  ;;  %v50_v15 = vld [vmem:[%s520_s3 + $0x48] sm:$0xff]  ;;  %v30_v17 = vld [vmem:[%s522_s2 + $0x38] sm:$0xff]  ;;  %v25_v19 = vld [vmem:[%s522_s2 + $0x10] sm:$0xff] }
   0x7   :  { %201 = vmatpush.msra.mxu0 %v39_v4  ;;  %114 = vperm.xlu2 %340, %v52_v11   ;;  %v36_v18 = vld [vmem:[%s522_s2 + $0x68] sm:$0xff]  ;;  %v47_v21 = vld [vmem:[%s520_s3 + $0x30] sm:$0xff]  ;;  %v48_v22 = vld [vmem:[%s520_s3 + $0x38] sm:$0xff] }
   0x8   :  { %317 = vmatmul.msk.f32.vlgmr.msra.gmra.mxu0 %vm137_vm0, %v23_v7  ;;  %v46_v20 = vld [vmem:[%s520_s3 + $0x28] sm:$0xff]  ;;  %v31_v23 = vld [vmem:[%s522_s2 + $0x40] sm:$0xff]  ;;  %v37_v24 = vld [vmem:[%s522_s2 + $0x70] sm:$0xff] }
   0x9   :  { %v26_v25 = vld [vmem:[%s522_s2 + $0x18] sm:$0xff]  ;;  %v43_v26 = vld [vmem:[%s520_s3 + $0x10] sm:$0xff]  ;;  %v45_v28 = vld [vmem:[%s520_s3 + $0x20] sm:$0xff] }
   0xa   :  { %119 = vperm.xlu1 %339, %v53_v8   ;;  %129 = vperm.xlu0 %338, %v55_v9   ;;  %v44_v27 = vld [vmem:[%s520_s3 + $0x18] sm:$0xff]  ;;  %v32_v29 = vld [vmem:[%s522_s2 + $0x48] sm:$0xff]  ;;  %v27_v31 = vld [vmem:[%s522_s2 + $0x20] sm:$0xff] }
   0xb   :  { %v38_v30 = vld [vmem:[%s522_s2 + $0x78] sm:$0xff]  ;;  %v268_v32 = vld [vmem:[%s523_s5] sm:$0xff]  ;;  %v42_v34 = vld [vmem:[%s520_s3 + $0x8] sm:$0xff] }
   0xc   :  { %v41_v33 = vld [vmem:[%s520_s3] sm:$0xff]  ;;  %v33_v35 = vld [vmem:[%s522_s2 + $0x50] sm:$0xff] }
   0xe   :  { %323 = vmatmul.msk.f32.gmra.mxu2 %vm137_vm0, %v29_v10  ;;  %329 = vmatmul.msk.f32.gmra.mxu3 %vm137_vm0, %v35_v12 }
   0xf   :  { %109 = vperm.xlu2 %340, %v51_v16  }
  0x10   :  { %318 = vmatmul.msk.f32.gmra.mxu0 %vm137_vm0, %v24_v13 }
  0x12   :  { %99 = vperm.xlu1 %339, %v49_v14   ;;  %104 = vperm.xlu0 %338, %v50_v15  }
  0x16   :  { %324 = vmatmul.msk.f32.gmra.mxu2 %vm137_vm0, %v30_v17  ;;  %330 = vmatmul.msk.f32.gmra.mxu3 %vm137_vm0, %v36_v18 }
  0x17   :  { %94 = vperm.xlu2 %340, %v48_v22  }
  0x18   :  { %319 = vmatmul.msk.f32.gmra.mxu0 %vm137_vm0, %v25_v19 }
  0x1a   :  { %84 = vperm.xlu1 %339, %v46_v20   ;;  %89 = vperm.xlu0 %338, %v47_v21  }
  0x1e   :  { %325 = vmatmul.msk.f32.gmra.mxu2 %vm137_vm0, %v31_v23  ;;  %331 = vmatmul.msk.f32.gmra.mxu3 %vm137_vm0, %v37_v24 }
  0x1f   :  { %79 = vperm.xlu2 %340, %v45_v28  }
  0x20   :  { %320 = vmatmul.msk.f32.gmra.mxu0 %vm137_vm0, %v26_v25 }
  0x22   :  { %69 = vperm.xlu1 %339, %v43_v26   ;;  %74 = vperm.xlu0 %338, %v44_v27  }
  0x26   :  { %326 = vmatmul.msk.f32.gmra.mxu2 %vm137_vm0, %v32_v29  ;;  %332 = vmatmul.msk.f32.gmra.mxu3 %vm137_vm0, %v38_v30 }
  0x27   :  { %64 = vperm.xlu2 %340, %v42_v34  }
  0x28   :  { %321 = vmatmul.msk.f32.gmra.mxu0 %vm137_vm0, %v27_v31 }
  0x2a   :  { %271 = vperm.xlu1 %339, %v268_v32   ;;  %59 = vperm.xlu0 %338, %v41_v33  }
  0x2e   :  { %327 = vmatmul.msk.f32.gmra.mxu2 %vm137_vm0, %v33_v35 }
  0x61   :  { %v115_v43 = vpop.permute.xlu2 %114 }
  0x69   :  { %v110_v50 = vpop.permute.xlu2 %109 }
  0x71   :  { %v95_v60 = vpop.permute.xlu2 %94 }
  0x74   :  { %v135_v39 = vpop.permute.xlu0 %134  ;;  %v125_v45 = vpop.permute.xlu1 %124 }
  0x79   :  { %v80_v11 = vpop.permute.xlu2 %79 }
  0x7c   :  { %v130_v46 = vpop.permute.xlu0 %129  ;;  %v120_v51 = vpop.permute.xlu1 %119 }
  0x81   :  { %v65_v26 = vpop.permute.xlu2 %64 }
  0x84   :  { %v105_v52 = vpop.permute.xlu0 %104  ;;  %v100_v63 = vpop.permute.xlu1 %99 }
  0x85   :  { %v502_v41 = vpop.f32.mrf.mxu0 }
  0x89   :  { %v218_v36 = vpop.f32.mrf.mxu2  ;;  %v236_v37 = vpop.f32.mrf.mxu3 }
  0x8a   :  { %v237_v1 = vadd.f32 %v236_v37, %v115_v43 }
  0x8c   :  { %v90_v0 = vpop.permute.xlu0 %89  ;;  %v262_v7 = vmax.f32 %v237_v1, 0.0  ;;  %v85_v14 = vpop.permute.xlu1 %84 }
  0x8d   :  { %v206_v47 = vpop.f32.mrf.mxu0  ;;  %v219_v19 = vadd.f32 %v218_v36, %v85_v14  ;;  %v267_v36 = vld [vmem:[%s524_s4] sm:$0xff] }
  0x8e   :  { %v207_v31 = vadd.f32 %v206_v47, %v65_v26 }
  0x8f   :  { %v256_v23 = vmax.f32 %v219_v19, 0.0 }
  0x90   :  { %v252_v34 = vmax.f32 %v207_v31, 0.0 }
  0x91   :  { %v221_v38 = vpop.f32.mrf.mxu2  ;;  %v239_v40 = vpop.f32.mrf.mxu3 }
  0x92   :  { %v240_v61 = vadd.f32 %v239_v40, %v120_v51  ;;  %v222_v16 = vadd.f32 %v221_v38, %v90_v0 }
  0x94   :  { %v263_v5 = vmax.f32 %v240_v61, 0.0  ;;  %v75_v15 = vpop.permute.xlu0 %74  ;;  %v257_v21 = vmax.f32 %v222_v16, 0.0  ;;  %v70_v25 = vpop.permute.xlu1 %69 }
  0x95   :  { %v209_v53 = vpop.f32.mrf.mxu0 }
  0x96   :  { %v210_v27 = vadd.f32 %v209_v53, %v70_v25 }
  0x98   :  { %v253_v32 = vmax.f32 %v210_v27, 0.0 }
  0x99   :  { %v224_v42 = vpop.f32.mrf.mxu2  ;;  %v242_v44 = vpop.f32.mrf.mxu3 }
  0x9a   :  { %v243_v58 = vadd.f32 %v242_v44, %v125_v45  ;;  %v225_v12 = vadd.f32 %v224_v42, %v95_v60 }
  0x9c   :  { %v264_v2 = vmax.f32 %v243_v58, 0.0  ;;  %v258_v20 = vmax.f32 %v225_v12, 0.0  ;;  %v60_v29 = vpop.permute.xlu0 %59  ;;  %v272_v37 = vpop.permute.xlu1 %271 }
  0x9d   :  { %v212_v4 = vpop.f32.mrf.mxu0  ;;  %v204_v33 = vadd.f32 %v502_v41, %v60_v29  ;;  %v299_v41 = vld [vmem:[%s525_s1] sm:$0xf] }
  0x9e   :  { %v213_v24 = vadd.f32 %v212_v4, %v75_v15  ;;  %v301_v44 = vrot.slane %v299_v41, 4 }
  0x9f   :  { %v251_v35 = vmax.f32 %v204_v33, 0.0 }
  0xa0   :  { %v254_v30 = vmax.f32 %v213_v24, 0.0 }
  0xa1   :  { %v227_v48 = vpop.f32.mrf.mxu2  ;;  %v245_v49 = vpop.f32.mrf.mxu3 }
  0xa2   :  { %v246_v56 = vadd.f32 %v245_v49, %v130_v46  ;;  %v228_v9 = vadd.f32 %v227_v48, %v100_v63 }
  0xa4   :  { %v265_v62 = vmax.f32 %v246_v56, 0.0  ;;  %v259_v17 = vmax.f32 %v228_v9, 0.0 }
  0xa5   :  { %v215_v18 = vpop.f32.mrf.mxu0 }
  0xa6   :  { %v216_v22 = vadd.f32 %v215_v18, %v80_v11 }
  0xa8   :  { %v255_v28 = vmax.f32 %v216_v22, 0.0 }
  0xa9   :  { %v230_v54 = vpop.f32.mrf.mxu2  ;;  %v248_v55 = vpop.f32.mrf.mxu3 }
  0xaa   :  { %v249_v57 = vadd.f32 %v248_v55, %v135_v39  ;;  %v231_v8 = vadd.f32 %v230_v54, %v105_v52 }
  0xac   :  { %v266_v59 = vmax.f32 %v249_v57, 0.0  ;;  %v260_v13 = vmax.f32 %v231_v8, 0.0 }
  0xae   :  { %274 = vmatpush.msra.mxu1 %v266_v59 }
  0xb0   :  { %275 = vmatpush.msra.mxu1 %v265_v62 }
  0xb1   :  { %v233_v3 = vpop.f32.mrf.mxu2 }
  0xb2   :  { %v234_v6 = vadd.f32 %v233_v3, %v110_v50  ;;  %276 = vmatpush.msra.mxu1 %v264_v2 }
  0xb4   :  { %277 = vmatpush.msra.mxu1 %v263_v5  ;;  %v261_v10 = vmax.f32 %v234_v6, 0.0 }
  0xb6   :  { %278 = vmatpush.msra.mxu1 %v262_v7 }
  0xb8   :  { %279 = vmatpush.msra.mxu1 %v261_v10 }
  0xba   :  { %280 = vmatpush.msra.mxu1 %v260_v13 }
  0xbc   :  { %281 = vmatpush.msra.mxu1 %v259_v17 }
  0xbe   :  { %282 = vmatpush.msra.mxu1 %v258_v20 }
  0xc0   :  { %283 = vmatpush.msra.mxu1 %v257_v21 }
  0xc2   :  { %284 = vmatpush.msra.mxu1 %v256_v23 }
  0xc4   :  { %285 = vmatpush.msra.mxu1 %v255_v28 }
  0xc6   :  { %286 = vmatpush.msra.mxu1 %v254_v30 }
  0xc8   :  { %287 = vmatpush.msra.mxu1 %v253_v32 }
  0xca   :  { %288 = vmatpush.msra.mxu1 %v252_v34 }
  0xcc   :  { %289 = vmatpush.msra.mxu1 %v251_v35 }
  0xcd   :  { %290 = vmatmul.f32.vlgmr.msra.gmra.mxu1 %v267_v36 }
 0x14a   :  { %v291_v38 = vpop.f32.mrf.mxu1 }
 0x14b   :  { %v292_v39 = vadd.f32 %v291_v38, %v272_v37 }
 0x14d   :  { %341 = vtanh.f32 %v292_v39  ;;  %v296_v40 = vmul.f32 1.442695, %v292_v39 }
 0x14f   :  { %343 = vpow2.f32 %v296_v40 }
 0x153   :  { %v342_v42 = vpop.eup %341 }
 0x154   :  { %v295_v43 = vmul.f32 2.0, %v342_v42 }
 0x155   :  { %v344_v45 = vpop.eup %343 }
 0x156   :  { %v298_v46 = vadd.f32 1.0, %v344_v45  ;;  %310 = vst.msk [vmem:[%s526_s6 + $0x4] sm:$0xf] %vm308_vm1, %v295_v43 }
 0x158   :  { %v303_v47 = vmul.f32 %v301_v44, %v298_v46  ;;  %312 = vst.msk [vmem:[%s526_s6 + $0x4] sm:$0xf0] %vm311_vm2, %v298_v46 }
 0x15a   :  { %v305_v48 = vrot.slane %v303_v47, 4 }
 0x15c   :  { %v307_v49 = vadd.f32 %v305_v48, %v295_v43 }
 0x15e   :  { %309 = vst.msk [vmem:[%s526_s6] sm:$0xf] %vm308_vm1, %v307_v49 }

</bundles_post_ra>
